<compile_context>
chip_gen: v6e
topology: v6e:2x2x1
jax: 0.10.0
libtpu: 0.0.40
codegen_flags: <defaults>
</compile_context>

<pallas_src>
import functools

import jax
import jax.numpy as jnp
from jax.experimental import pallas as pl
from jax.experimental.pallas import tpu as pltpu

# TODO(synk): these could be chosen per chip generation via pltpu.get_tpu_info
# (128 MiB on v5e/v6e vs 64 MiB/TC on v7x); kept at values safe everywhere.
_VMEM_LIMIT = 48 * 1024 * 1024
_IMPLICIT_MAX_BYTES = 12 * 1024 * 1024   # VMEM gate for the implicit-conv path


def _round_up(x, m):
    return (x + m - 1) // m * m


# ----------------------------------------------------------------------------
# Pallas kernels
# ----------------------------------------------------------------------------
def _matmul_bn_act_kernel(a_ref, b_ref, sb_ref, *rest, apply_relu, has_residual):
    """Tiled bf16 matmul, f32 accumulator, fused scale/bias (+residual)(+ReLU)."""
    if has_residual:
        res_ref, o_ref, acc_ref = rest
    else:
        res_ref = None
        o_ref, acc_ref = rest

    k = pl.program_id(2)

    @pl.when(k == 0)
    def _():
        acc_ref[...] = jnp.zeros_like(acc_ref)

    acc_ref[...] += jnp.dot(a_ref[...], b_ref[...],
                            preferred_element_type=jnp.float32)

    @pl.when(k == pl.num_programs(2) - 1)
    def _():
        y = acc_ref[...] * sb_ref[0:1, :] + sb_ref[1:2, :]
        if has_residual:
            y = y + res_ref[...].astype(jnp.float32)
        if apply_relu:
            y = jnp.maximum(y, 0.0)
        o_ref[...] = y.astype(o_ref.dtype)


def _conv_s1_kernel(x_ref, w_ref, sb_ref, o_ref, acc_ref, *,
                    shifts, tm, row_axis, apply_relu):
    """Implicit-im2col stride-1 conv.

    x_ref : (lx, cin_chunk) bf16 -- whole spatially padded input (flattened
            over N, Hp, Wp), one Cin chunk per grid step along axis 2.
    w_ref : (KH*KW, cin_chunk, tn) bf16 weight chunk for the current Cout tile.
    sb_ref: (2, tn) f32 -- row 0 = scale, row 1 = bias (folded BN + conv bias).
    o_ref : (tm, tn) output tile; acc_ref: (tm, tn) f32 scratch.

    A conv tap (dh, dw) is a constant row shift of dh*Wp + dw in the flattened
    input: each tap is loaded directly from the ref (one vld-path operand at a
    time, no big live window), with the dynamic start kept 16-aligned and the
    sub-16 residue handled by a tiny static slice.
    """
    c = pl.program_id(2)

    @pl.when(c == 0)
    def _():
        acc_ref[...] = jnp.zeros_like(acc_ref)

    base = pl.multiple_of(pl.program_id(row_axis) * tm, 32)
    for t, shift in enumerate(shifts):
        lo = shift % 16                      # static sub-tile residue
        hi = shift - lo                      # static, multiple of 16
        start = pl.multiple_of(base + hi, 16)
        if lo == 0:
            a = x_ref[pl.ds(start, tm), :]
        else:
            a = x_ref[pl.ds(start, tm + 16), :][lo:lo + tm, :]
        acc_ref[...] += jnp.dot(a, w_ref[t],
                                preferred_element_type=jnp.float32)

    @pl.when(c == pl.num_programs(2) - 1)
    def _():
        y = acc_ref[...] * sb_ref[0:1, :] + sb_ref[1:2, :]
        if apply_relu:
            y = jnp.maximum(y, 0.0)
        o_ref[...] = y.astype(o_ref.dtype)


def _add_act_kernel(a_ref, b_ref, o_ref, *, apply_relu):
    y = a_ref[...] + b_ref[...]
    if apply_relu:
        y = jnp.maximum(y, 0.0)
    o_ref[...] = y.astype(o_ref.dtype)


# ----------------------------------------------------------------------------
# Pallas wrappers
# ----------------------------------------------------------------------------
@functools.partial(jax.jit, static_argnames=("relu", "out_dtype"))
def pallas_matmul_fused(a, b, sb, residual=None, *, relu, out_dtype):
    """(M,K)@(K,N) + per-column scale/bias (+residual) (+ReLU), adaptive tiles."""
    M, K = a.shape
    _, Ncol = b.shape

    TM = min(512 if M >= 1024 else 256, _round_up(M, 32))
    Mp = _round_up(M, TM)
    Np0 = _round_up(Ncol, 128)
    TN = min(256, Np0)
    Np = _round_up(Np0, TN)
    if K <= 512:
        Kp = TK = K                              # no padded-K work
    else:
        Kp = _round_up(K, 128)
        TK = next(c for c in (512, 384, 256, 128) if Kp % c == 0)

    a_p = a.astype(jnp.bfloat16)
    b_p = b.astype(jnp.bfloat16)
    if (Mp, Kp) != (M, K):
        a_p = jnp.pad(a_p, ((0, Mp - M), (0, Kp - K)))
    if (Kp, Np) != (K, Ncol):
        b_p = jnp.pad(b_p, ((0, Kp - K), (0, Np - Ncol)))
    sb_p = jnp.pad(sb, ((0, 0), (0, Np - Ncol))) if Np != Ncol else sb

    has_res = residual is not None
    operands = [a_p, b_p, sb_p]
    if has_res:
        r_p = residual.astype(jnp.bfloat16)
        if (Mp, Np) != (M, Ncol):
            r_p = jnp.pad(r_p, ((0, Mp - M), (0, Np - Ncol)))
        operands.append(r_p)

    m_tiles, n_tiles, k_tiles = Mp // TM, Np // TN, Kp // TK
    rows_first = m_tiles >= n_tiles              # larger parallel axis leads

    def _ij(g0, g1):
        return (g0, g1) if rows_first else (g1, g0)

    grid = (m_tiles, n_tiles, k_tiles) if rows_first else (n_tiles, m_tiles, k_tiles)
    in_specs = [
        pl.BlockSpec((TM, TK), lambda g0, g1, k: (_ij(g0, g1)[0], k)),
        pl.BlockSpec((TK, TN), lambda g0, g1, k: (k, _ij(g0, g1)[1])),
        pl.BlockSpec((2, TN), lambda g0, g1, k: (0, _ij(g0, g1)[1])),
    ]
    if has_res:
        in_specs.append(pl.BlockSpec((TM, TN), lambda g0, g1, k: _ij(g0, g1)))

    out = pl.pallas_call(
        functools.partial(_matmul_bn_act_kernel,
                          apply_relu=relu, has_residual=has_res),
        out_shape=jax.ShapeDtypeStruct((Mp, Np), out_dtype),
        grid=grid,
        in_specs=in_specs,
        out_specs=pl.BlockSpec((TM, TN), lambda g0, g1, k: _ij(g0, g1)),
        scratch_shapes=[pltpu.VMEM((TM, TN), jnp.float32)],
        compiler_params=pltpu.CompilerParams(
            dimension_semantics=("parallel", "parallel", "arbitrary"),
            vmem_limit_bytes=_VMEM_LIMIT,
        ),
    )(*operands)
    if (Mp, Np) != (M, Ncol):
        out = out[:M, :Ncol]
    return out


@functools.partial(jax.jit, static_argnames=("relu", "out_dtype", "padding"))
def pallas_conv_s1(x, w, sb, *, relu, out_dtype, padding):
    """Stride-1 KxK conv via implicit in-kernel im2col + fused BN/ReLU."""
    N, H, W, Cin = x.shape
    KH, KW, _, Cout = w.shape
    Hp, Wp = H + 2 * padding, W + 2 * padding
    Ho, Wo = Hp - KH + 1, Wp - KW + 1

    xp = x
    if padding:
        xp = jnp.pad(x, ((0, 0), (padding, padding), (padding, padding), (0, 0)))

    # NOTE: output rows span the full padded grid (N*Hp*Wp); rows/cols outside
    # the valid (Ho, Wo) range hold garbage that is ONLY removed by the final
    # crop below -- do not remove that crop.
    # TODO(synk): restructure to per-image N*Ho*Wp row blocks to trim the
    # padded-row overcompute on the deep (small-spatial) layers.
    m_out = N * Hp * Wp
    tm = min(256, _round_up(m_out, 32))
    mp = _round_up(m_out, tm)
    shift_max = (KH - 1) * Wp + (KW - 1)
    lx = mp + _round_up(shift_max, 16) + 16      # slack so every tap is in-bounds

    cin_chunk = Cin if Cin <= 256 else 256       # weight-chunk grid axis
    cinp = _round_up(Cin, cin_chunk)
    n_cin = cinp // cin_chunk

    x_flat = xp.astype(jnp.bfloat16).reshape(m_out, Cin)
    x_flat = jnp.pad(x_flat, ((0, lx - m_out), (0, cinp - Cin)))

    np0 = _round_up(Cout, 128)
    tn = min(256, np0)
    npad = _round_up(np0, tn)
    w2 = w.reshape(KH * KW, Cin, Cout).astype(jnp.bfloat16)
    sb_p = sb
    if (cinp, npad) != (Cin, Cout):
        w2 = jnp.pad(w2, ((0, 0), (0, cinp - Cin), (0, npad - Cout)))
        sb_p = jnp.pad(sb, ((0, 0), (0, npad - Cout)))

    shifts = tuple(dh * Wp + dw for dh in range(KH) for dw in range(KW))

    m_tiles, n_tiles = mp // tm, npad // tn
    rows_first = m_tiles >= n_tiles              # larger parallel axis leads
    row_axis = 0 if rows_first else 1

    def _ij(g0, g1):
        return (g0, g1) if rows_first else (g1, g0)

    grid = (m_tiles, n_tiles, n_cin) if rows_first else (n_tiles, m_tiles, n_cin)

    kernel = functools.partial(_conv_s1_kernel, shifts=shifts, tm=tm,
                               row_axis=row_axis, apply_relu=relu)

    # TODO(synk): the x block's index map is constant in the parallel axes, so
    # pl.Buffered(1) would halve its VMEM footprint; kept default-buffered for
    # lowering safety (the 2x cost is accounted for in the conv2d_fused gate).
    out = pl.pallas_call(
        kernel,
        out_shape=jax.ShapeDtypeStruct((mp, npad), out_dtype),
        grid=grid,
        in_specs=[
            pl.BlockSpec((lx, cin_chunk), lambda g0, g1, c: (0, c)),
            pl.BlockSpec((KH * KW, cin_chunk, tn),
                         lambda g0, g1, c: (0, c, _ij(g0, g1)[1])),
            pl.BlockSpec((2, tn), lambda g0, g1, c: (0, _ij(g0, g1)[1])),
        ],
        out_specs=pl.BlockSpec((tm, tn), lambda g0, g1, c: _ij(g0, g1)),
        scratch_shapes=[pltpu.VMEM((tm, tn), jnp.float32)],
        compiler_params=pltpu.CompilerParams(
            dimension_semantics=("parallel", "parallel", "arbitrary"),
            vmem_limit_bytes=_VMEM_LIMIT,
        ),
    )(x_flat, w2, sb_p)

    out = out[:m_out, :Cout].reshape(N, Hp, Wp, Cout)[:, :Ho, :Wo, :]
    return out


@functools.partial(jax.jit, static_argnames=("relu",))
def pallas_add_act(a, b, *, relu):
    """Tiled elementwise add (+ optional ReLU) on lane-dense (rows, C) slabs."""
    C = a.shape[-1]
    orig_shape = a.shape
    a2 = a.reshape(-1, C)
    b2 = b.astype(a.dtype).reshape(-1, C)
    M = a2.shape[0]
    TMr = min(512, _round_up(M, 8))
    Mp = _round_up(M, TMr)
    if Mp != M:
        a2 = jnp.pad(a2, ((0, Mp - M), (0, 0)))
        b2 = jnp.pad(b2, ((0, Mp - M), (0, 0)))
    out = pl.pallas_call(
        functools.partial(_add_act_kernel, apply_relu=relu),
        out_shape=jax.ShapeDtypeStruct((Mp, C), a.dtype),
        grid=(Mp // TMr,),
        in_specs=[pl.BlockSpec((TMr, C), lambda i: (i, 0)),
                  pl.BlockSpec((TMr, C), lambda i: (i, 0))],
        out_specs=pl.BlockSpec((TMr, C), lambda i: (i, 0)),
        compiler_params=pltpu.CompilerParams(
            dimension_semantics=("parallel",),
            vmem_limit_bytes=_VMEM_LIMIT,
        ),
    )(a2, b2)
    if Mp != M:
        out = out[:M]
    return out.reshape(orig_shape)


# ----------------------------------------------------------------------------
# Conv / pooling / resize glue
# ----------------------------------------------------------------------------
def conv2d_fused(x, w, sb, stride, padding, relu, out_dtype, residual=None):
    """x: (N,H,W,Cin) NHWC, w: (KH,KW,Cin,Cout), sb: (2,Cout) scale/bias."""
    N, H, W, _ = x.shape
    KH, KW, Cin, Cout = w.shape

    if KH == 1 and KW == 1:
        xs = x[:, ::stride, ::stride, :] if stride > 1 else x
        n, h, w_, _ = xs.shape
        a = xs.reshape(n * h * w_, Cin)
        res2 = residual.reshape(n * h * w_, Cout) if residual is not None else None
        out = pallas_matmul_fused(a, w.reshape(Cin, Cout), sb, res2,
                                  relu=relu, out_dtype=out_dtype)
        return out.reshape(n, h, w_, Cout)

    assert residual is None  # residual fusion only wired up for 1x1 convs

    if stride == 1:
        hp, wp = H + 2 * padding, W + 2 * padding
        rows = N * hp * wp
        tm = min(256, _round_up(rows, 32))
        tn = min(256, _round_up(Cout, 128))
        cin_chunk = Cin if Cin <= 256 else 256
        x_bytes = (_round_up(rows, tm) + 64) * cin_chunk * 2     # bf16 resident x
        w_bytes = KH * KW * cin_chunk * tn * 2                   # bf16 weight chunk
        io_bytes = tm * tn * 12                                  # acc + out tiles
        if 2 * (x_bytes + w_bytes) + io_bytes <= _IMPLICIT_MAX_BYTES:
            return pallas_conv_s1(x, w, sb, relu=relu, out_dtype=out_dtype,
                                  padding=padding)

    # Fallback: explicit im2col (strided convs; oversized stride-1 convs).
    # TODO(synk): replace with an implicit strided variant (stride^2 phase
    # split) so the stem / downsample 3x3s stop materializing KH*KW x input.
    xp = x
    if padding > 0:
        xp = jnp.pad(x, ((0, 0), (padding, padding), (padding, padding), (0, 0)))
    Hp, Wp = xp.shape[1], xp.shape[2]
    Ho = (Hp - KH) // stride + 1
    Wo = (Wp - KW) // stride + 1
    cols = [xp[:, dh:dh + stride * (Ho - 1) + 1:stride,
               dw:dw + stride * (Wo - 1) + 1:stride, :]
            for dh in range(KH) for dw in range(KW)]
    a = jnp.concatenate(cols, axis=-1).reshape(N * Ho * Wo, KH * KW * Cin)
    b = w.reshape(KH * KW * Cin, Cout)
    out = pallas_matmul_fused(a, b, sb, relu=relu, out_dtype=out_dtype)
    return out.reshape(N, Ho, Wo, Cout)


def conv_bn_act(x, conv_p, bn_p, stride, padding, relu,
                out_dtype=jnp.bfloat16, residual=None):
    w = conv_p["w"]
    cout = w.shape[-1]
    cb = conv_p.get("b")
    if cb is None:
        cb = jnp.zeros((cout,), jnp.float32)
    if bn_p is None:
        scale = jnp.ones((cout,), jnp.float32)
        bias = cb
    else:
        inv = bn_p["gamma"] / jnp.sqrt(bn_p["var"] + 1e-5)
        scale = inv
        bias = (cb - bn_p["mean"]) * inv + bn_p["beta"]
    sb = jnp.stack([scale, bias], axis=0).astype(jnp.float32)   # (2, Cout)
    return conv2d_fused(x, w, sb, stride, padding, relu, out_dtype,
                        residual=residual)


def maxpool_3x3_s2_p1(x):
    # TODO(synk): max-pool kept as plain-JAX strided slices (tiny vs. the convs).
    N, H, W, C = x.shape
    neg = jnp.finfo(x.dtype).min
    xp = jnp.pad(x, ((0, 0), (1, 1), (1, 1), (0, 0)), constant_values=neg)
    Ho = (H + 2 - 3) // 2 + 1
    Wo = (W + 2 - 3) // 2 + 1
    out = None
    for dh in range(3):
        for dw in range(3):
            s = xp[:, dh:dh + 2 * (Ho - 1) + 1:2, dw:dw + 2 * (Wo - 1) + 1:2, :]
            out = s if out is None else jnp.maximum(out, s)
    return out


def bilinear_resize(x, out_h, out_w):
    """PyTorch bilinear, align_corners=False (half-pixel centers). NHWC."""
    # TODO(synk): gather-based bilinear interpolation left in plain JAX.
    N, H, W, C = x.shape
    dtype = x.dtype
    xf = x.astype(jnp.float32)

    def coords(out_size, in_size):
        i = jnp.arange(out_size, dtype=jnp.float32)
        src = (i + 0.5) * (in_size / out_size) - 0.5
        src = jnp.clip(src, 0.0, in_size - 1)
        i0 = jnp.floor(src).astype(jnp.int32)
        i1 = jnp.minimum(i0 + 1, in_size - 1)
        return i0, i1, src - i0.astype(jnp.float32)

    h0, h1, fh = coords(out_h, H)
    w0, w1, fw = coords(out_w, W)
    top = xf[:, h0, :, :]
    bot = xf[:, h1, :, :]
    rows = top * (1.0 - fh)[None, :, None, None] + bot * fh[None, :, None, None]
    left = rows[:, :, w0, :]
    right = rows[:, :, w1, :]
    out = left * (1.0 - fw)[None, None, :, None] + right * fw[None, None, :, None]
    return out.astype(dtype)


def cross_entropy_ignore(logits_nchw, labels, ignore_index=255):
    # TODO(synk): CE loss (21 classes) kept in plain JAX; not the hot path.
    N, C, H, W = logits_nchw.shape
    lg = jnp.transpose(logits_nchw, (0, 2, 3, 1)).reshape(-1, C)
    lb = labels.reshape(-1)
    valid = (lb != ignore_index)
    lb_safe = jnp.where(valid, lb, 0)
    logz = jax.nn.logsumexp(lg, axis=-1)
    picked = jnp.take_along_axis(lg, lb_safe[:, None], axis=-1)[:, 0]
    nll = (logz - picked) * valid.astype(jnp.float32)
    return jnp.sum(nll) / jnp.maximum(jnp.sum(valid.astype(jnp.float32)), 1.0)


# ----------------------------------------------------------------------------
# Deterministic parameter construction (ResNet-50 + decoders + classifier)
# ----------------------------------------------------------------------------
class ParamGen:
    def __init__(self, seed=0):
        self._key = jax.random.PRNGKey(seed)
        self._n = 0

    def _next(self):
        self._n += 1
        return jax.random.fold_in(self._key, self._n)

    def conv(self, kh, kw, cin, cout, use_bias=False):
        std = 0.5 * (2.0 / (kh * kw * cin)) ** 0.5
        p = {"w": std * jax.random.normal(self._next(), (kh, kw, cin, cout),
                                          jnp.float32)}
        if use_bias:
            p["b"] = jnp.zeros((cout,), jnp.float32)
        return p

    def bn(self, c):
        return {"gamma": jnp.ones((c,), jnp.float32),
                "beta": jnp.zeros((c,), jnp.float32),
                "mean": jnp.zeros((c,), jnp.float32),
                "var": jnp.ones((c,), jnp.float32)}


def make_bottleneck(pg, inplanes, planes, stride):
    p = {"conv1": pg.conv(1, 1, inplanes, planes), "bn1": pg.bn(planes),
         "conv2": pg.conv(3, 3, planes, planes), "bn2": pg.bn(planes),
         "conv3": pg.conv(1, 1, planes, planes * 4), "bn3": pg.bn(planes * 4),
         "stride": stride}
    if stride != 1 or inplanes != planes * 4:
        p["down_conv"] = pg.conv(1, 1, inplanes, planes * 4)
        p["down_bn"] = pg.bn(planes * 4)
    return p


def make_layer(pg, inplanes, planes, blocks, stride):
    ps = [make_bottleneck(pg, inplanes, planes, stride)]
    for _ in range(blocks - 1):
        ps.append(make_bottleneck(pg, planes * 4, planes, 1))
    return ps


def make_decoder(pg, cin, cout):
    return {"conv": pg.conv(3, 3, cin, cout, use_bias=True), "bn": pg.bn(cout)}


def build_params(num_classes=21, seed=0):
    pg = ParamGen(seed)
    return {
        "conv1": pg.conv(7, 7, 3, 64), "bn1": pg.bn(64),
        "layer1": make_layer(pg, 64, 64, 3, 1),
        "layer2": make_layer(pg, 256, 128, 4, 2),
        "layer3": make_layer(pg, 512, 256, 6, 2),
        "layer4": make_layer(pg, 1024, 512, 3, 2),
        "decoder4": make_decoder(pg, 2048, 1024),
        "decoder3": make_decoder(pg, 1024, 512),
        "decoder2": make_decoder(pg, 512, 256),
        "decoder1": make_decoder(pg, 256, 64),
        "classifier": pg.conv(1, 1, 64, num_classes, use_bias=True),
    }


# ----------------------------------------------------------------------------
# Forward pass
# ----------------------------------------------------------------------------
def bottleneck_forward(x, p):
    if "down_conv" in p:
        identity = conv_bn_act(x, p["down_conv"], p["down_bn"], p["stride"], 0,
                               False)
    else:
        identity = x
    out = conv_bn_act(x, p["conv1"], p["bn1"], 1, 0, True)
    out = conv_bn_act(out, p["conv2"], p["bn2"], p["stride"], 1, True)
    # conv3 + BN + residual add + ReLU fused into one matmul epilogue.
    out = conv_bn_act(out, p["conv3"], p["bn3"], 1, 0, True, residual=identity)
    return out


def layer_forward(x, blocks):
    for blk in blocks:
        x = bottleneck_forward(x, blk)
    return x


def decoder_block(x, p):
    y = conv_bn_act(x, p["conv"], p["bn"], 1, 1, True)
    _, H, W, _ = y.shape
    return bilinear_resize(y, 2 * H, 2 * W)


def birefnet_forward(params, x_nchw, labels=None):
    # NCHW -> NHWC; intermediate activations are carried in bf16.
    x = jnp.transpose(x_nchw, (0, 2, 3, 1)).astype(jnp.bfloat16)
    x0 = conv_bn_act(x, params["conv1"], params["bn1"], 2, 3, True)
    x0 = maxpool_3x3_s2_p1(x0)
    x1 = layer_forward(x0, params["layer1"])
    x2 = layer_forward(x1, params["layer2"])
    x3 = layer_forward(x2, params["layer3"])
    x4 = layer_forward(x3, params["layer4"])

    d4 = pallas_add_act(decoder_block(x4, params["decoder4"]), x3, relu=False)
    d3 = pallas_add_act(decoder_block(d4, params["decoder3"]), x2, relu=False)
    d2 = pallas_add_act(decoder_block(d3, params["decoder2"]), x1, relu=False)
    d1 = decoder_block(d2, params["decoder1"])

    logits = conv_bn_act(d1, params["classifier"], None, 1, 0, False,
                         out_dtype=jnp.float32)
    logits = bilinear_resize(logits, x_nchw.shape[2], x_nchw.shape[3])
    logits_nchw = jnp.transpose(logits, (0, 3, 1, 2))  # back to NCHW like PyTorch

    outputs = {"logits": logits_nchw}
    if labels is not None:
        outputs["loss"] = cross_entropy_ignore(logits_nchw, labels)
    return outputs


if __name__ == "__main__":
    key = jax.random.PRNGKey(0)
    kx, kl = jax.random.split(key)
    # Small input consistent with the module: 3-channel image, 64x64 so that
    # x4 ends up 2x2 and the decoder/residual shapes line up exactly.
    x = jax.random.normal(kx, (2, 3, 64, 64), jnp.float32)
    labels = jax.random.randint(kl, (2, 64, 64), 0, 21).astype(jnp.int32)
    labels = labels.at[:, :2, :2].set(255)  # exercise ignore_index

    params = build_params(num_classes=21, seed=0)
    out = birefnet_forward(params, x, labels)
    logits = jax.block_until_ready(out["logits"])
    loss = jax.block_until_ready(out["loss"])

    assert logits.shape == (2, 21, 64, 64)
    assert bool(jnp.isfinite(loss))
    print("KERNEL_OK")
</pallas_src>

<mosaic_0001>
module attributes {stable_mosaic.version = 11 : i64} {
  func.func @_matmul_bn_act_kernel(%arg0: i32, %arg1: i32, %arg2: i32, %arg3: memref<512x147xbf16, #tpu.memory_space<vmem>>, %arg4: memref<147x128xbf16, #tpu.memory_space<vmem>>, %arg5: memref<2x128xf32, #tpu.memory_space<vmem>>, %arg6: memref<512x128xbf16, #tpu.memory_space<vmem>>, %arg7: memref<512x128xf32, #tpu.memory_space<vmem>>) attributes {dimension_semantics = [#tpu.dimension_semantics<parallel>, #tpu.dimension_semantics<parallel>, #tpu.dimension_semantics<arbitrary>], iteration_bounds = array<i64: 4, 1, 1>, scalar_prefetch = 0 : i64, scratch_operands = 1 : i64, tpu.core_type = #tpu.core_type<tc>, window_params = [{transform_indices = @transform_0, window_bounds = array<i64: 512, 147>}, {transform_indices = @transform_1, window_bounds = array<i64: 147, 128>}, {transform_indices = @transform_2, window_bounds = array<i64: 2, 128>}, {transform_indices = @transform_3, window_bounds = array<i64: 512, 128>}]} {
    %c0_i32 = arith.constant 0 : i32
    %0 = arith.cmpi eq, %arg2, %c0_i32 : i32
    %1 = arith.extui %0 : i1 to i32
    %c0_i32_0 = arith.constant 0 : i32
    %2 = arith.cmpi ne, %1, %c0_i32_0 : i32
    scf.if %2 {
      %cst_10 = arith.constant 0.000000e+00 : f32
      %12 = vector.broadcast %cst_10 : f32 to vector<512x128xf32>
      %c0_11 = arith.constant 0 : index
      %c0_12 = arith.constant 0 : index
      %13 = vector.load %arg7[%c0_11, %c0_12] : memref<512x128xf32, #tpu.memory_space<vmem>>, vector<512x128xf32>
      tpu.vector_store %arg7[%c0_11, %c0_12], %12 {strides = array<i32>} : memref<512x128xf32, #tpu.memory_space<vmem>>, vector<512x128xf32>,
    } else {
    }
    %c0 = arith.constant 0 : index
    %c0_1 = arith.constant 0 : index
    %3 = vector.load %arg7[%c0, %c0_1] : memref<512x128xf32, #tpu.memory_space<vmem>>, vector<512x128xf32>
    %c0_2 = arith.constant 0 : index
    %c0_3 = arith.constant 0 : index
    %4 = vector.load %arg3[%c0_2, %c0_3] : memref<512x147xbf16, #tpu.memory_space<vmem>>, vector<512x147xbf16>
    %c0_4 = arith.constant 0 : index
    %c0_5 = arith.constant 0 : index
    %5 = vector.load %arg4[%c0_4, %c0_5] : memref<147x128xbf16, #tpu.memory_space<vmem>>, vector<147x128xbf16>
    %cst = arith.constant dense<0.000000e+00> : vector<512x128xf32>
    %6 = tpu.matmul %4, %5, %cst {dimension_numbers = #tpu.dot_dimension_numbers<[1], [0], [0], [1], [0, 0, 1, 1], [], []>} : vector<512x147xbf16>, vector<147x128xbf16>, vector<512x128xf32> -> vector<512x128xf32>
    %7 = arith.addf %3, %6 : vector<512x128xf32>
    %c0_6 = arith.constant 0 : index
    %c0_7 = arith.constant 0 : index
    %8 = vector.load %arg7[%c0_6, %c0_7] : memref<512x128xf32, #tpu.memory_space<vmem>>, vector<512x128xf32>
    tpu.vector_store %arg7[%c0_6, %c0_7], %7 {strides = array<i32>} : memref<512x128xf32, #tpu.memory_space<vmem>>, vector<512x128xf32>,
    %c0_i32_8 = arith.constant 0 : i32
    %9 = arith.cmpi eq, %arg2, %c0_i32_8 : i32
    %10 = arith.extui %9 : i1 to i32
    %c0_i32_9 = arith.constant 0 : i32
    %11 = arith.cmpi ne, %10, %c0_i32_9 : i32
    scf.if %11 {
      %c0_10 = arith.constant 0 : index
      %c0_11 = arith.constant 0 : index
      %12 = vector.load %arg7[%c0_10, %c0_11] : memref<512x128xf32, #tpu.memory_space<vmem>>, vector<512x128xf32>
      %c0_12 = arith.constant 0 : index
      %c0_13 = arith.constant 0 : index
      %13 = vector.load %arg5[%c0_12, %c0_13] : memref<2x128xf32, #tpu.memory_space<vmem>>, vector<1x128xf32>
      %14 = vector.broadcast %13 : vector<1x128xf32> to vector<512x128xf32>
      %15 = arith.mulf %12, %14 : vector<512x128xf32>
      %c1 = arith.constant 1 : index
      %c0_14 = arith.constant 0 : index
      %16 = vector.load %arg5[%c1, %c0_14] : memref<2x128xf32, #tpu.memory_space<vmem>>, vector<1x128xf32>
      %17 = vector.broadcast %16 : vector<1x128xf32> to vector<512x128xf32>
      %18 = arith.addf %15, %17 : vector<512x128xf32>
      %cst_15 = arith.constant 0.000000e+00 : f32
      %19 = vector.broadcast %cst_15 : f32 to vector<512x128xf32>
      %20 = arith.maximumf %18, %19 : vector<512x128xf32>
      %21 = arith.truncf %20 : vector<512x128xf32> to vector<512x128xbf16>
      %c0_16 = arith.constant 0 : index
      %c0_17 = arith.constant 0 : index
      %22 = vector.load %arg6[%c0_16, %c0_17] : memref<512x128xbf16, #tpu.memory_space<vmem>>, vector<512x128xbf16>
      tpu.vector_store %arg6[%c0_16, %c0_17], %21 {strides = array<i32>} : memref<512x128xbf16, #tpu.memory_space<vmem>>, vector<512x128xbf16>,
    } else {
    }
    return
  }
  func.func @transform_0(%arg0: i32, %arg1: i32, %arg2: i32) -> (i32, i32) {
    %c0_i32 = arith.constant 0 : i32
    return %arg0, %arg2 : i32, i32
  }
  func.func @transform_1(%arg0: i32, %arg1: i32, %arg2: i32) -> (i32, i32) {
    %c0_i32 = arith.constant 0 : i32
    return %arg2, %arg1 : i32, i32
  }
  func.func @transform_2(%arg0: i32, %arg1: i32, %arg2: i32) -> (i32, i32) {
    %c0_i32 = arith.constant 0 : i32
    %c0_i32_0 = arith.constant 0 : i32
    return %c0_i32, %arg1 : i32, i32
  }
  func.func @transform_3(%arg0: i32, %arg1: i32, %arg2: i32) -> (i32, i32) {
    %c0_i32 = arith.constant 0 : i32
    return %arg0, %arg1 : i32, i32
  }
}

</mosaic_0001>

<bundles_post_ra>
// kernel: pallas_matmul_fused.1
= control target key start
LH: loop header
LB: loop body
LE: loop exit
PB: predicated region body
PF: predicated region fallthrough
CT: control target
= control target key end

     0   :  { %s2698_s12 = smov 0   ;;  %s2700_s13 = smov 0   ;;  %s3035_s0 = inlined_call_operand.vmem [shape: bf16[2048,147], index: 0, kind: input, shape index: {}]   ;;  %s3036_s1 = inlined_call_operand.vmem [shape: bf16[147,128], index: 1, kind: input, shape index: {}]   ;;  %s3037_s2 = inlined_call_operand.vmem [shape: f32[2,128], index: 2, kind: input, shape index: {}]   ;;  %s3038_s3 = inlined_call_operand.vmem [shape: bf16[2048,128], index: 3, kind: output, shape index: {}]  }
   0x1   :  { %s2702_s14 = smov 0  }
   0x2 LB: > { %s32_s15 = sadd.s32 1, %s2670_s13  ;;  %p2064_p0 = scmp.ge.s32.totalorder %s2674_s14, 1  ;;  %s2674_s14 = sphi %s2702_s14, %s13_s14   ;;  %s2670_s13 = sphi %s2700_s13, %s3040_s13   ;;  %s2666_s12 = sphi %s2698_s12, %s3039_s12  }
   0x3   : > { %p34_p1 = scmp.ge.s32.totalorder %s32_s15, 4  ;;  %p192_p2 = scmp.lt.s32.totalorder %s2674_s14, 5 }
   0x5   : > { %s3042_s15 = smov (%p34_p1, %s32_s15), 0  ;;  %p193_p3 = pnand %p2064_p0, %p192_p2 }
   0x6   : > { %s2065_s22 = sshll.u32 (!%p193_p3), %s2666_s12, 6 }
   0x7   : > { %196 = sbr.rel (%p193_p3) target bundleno = 379 (0x17b), region = 32  ;;  %p238_p4 = scmp.lt.s32.totalorder (!%p193_p3), %s2065_s22, 255 }
   0xc   : > { %v2546_v0 = vld [vmem:[%s3036_s1 + $0x38] sm:$0xff]   ;;  %v2676_v1 = vmov 0   ;;  %v2547_v2 = vld [vmem:[%s3036_s1 + $0x30] sm:$0xff]   ;;  %v2548_v3 = vld [vmem:[%s3036_s1 + $0x28] sm:$0xff]   ;;  %s3044_s22 = smov (!%p238_p4, %s2065_s22), 255  ;;  %vm831_vm0 = vcmask 154624  }
   0xd   : > { %935 = vmatprep.subr.bf16.mxu0 %v2676_v1  ;;  %2500 = vmatprep.subr.bf16.mxu1 %v2676_v1  ;;  %v2549_v4 = vld [vmem:[%s3036_s1 + $0x20] sm:$0xff]   ;;  %s2244_s25 = sshll.u32 %s3044_s22, 3  ;;  %v2550_v5 = vld [vmem:[%s3036_s1 + $0x18] sm:$0xff]   ;;  %v2551_v8 = vld [vmem:[%s3036_s1 + $0x10] sm:$0xff]   ;;  %vm928_vm1 = vcmask 1040384   ;;  %vm929_vm2 = vcmask 1041408  }
   0xe   : > { %936 = vmatpush1.bf16.msra.mxu0 %v2546_v0  ;;  %2510 = vmatpush1.bf16.msra.mxu1 %v2546_v0  ;;  %s2734_s28 = scalar_lea.vmem %s3035_s0, %s2244_s25  ;;  %v2552_v9 = vld [vmem:[%s3036_s1 + $0x8] sm:$0xff]   ;;  %v2677_v10 = vmov 65535   ;;  %v2553_v12 = vld [vmem:[%s3036_s1] sm:$0xff]   ;;  %s2069_s21 = sshll.u32 %s3044_s22, 2 }
   0xf   : > { %937 = vmatprep.subr.bf16.mxu0 %v2676_v1  ;;  %2501 = vmatprep.subr.bf16.mxu1 %v2676_v1  ;;  %v2558_v6 = vld [vmem:[%s2734_s28 + $0x4] ss:$8 sps:$4 sm:$0xff]   ;;  %v930_v11 = vsel %vm928_vm1, 4294967295, %v2677_v10  ;;  %v2554_v13 = vld [vmem:[%s3036_s1 + $0x48] ss:$0 sps:$4 sm:$0x33]   ;;  %s2874_s25 = scalar_lea.vmem %s3038_s3, %s2069_s21 }
  0x10   : > { %v2561_v7 = vld [vmem:[%s2734_s28 + $0x104] ss:$8 sps:$4 sm:$0xff]   ;;  %2144 = vmatprep.mubr.msk.bf16.mxu0 %vm831_vm0, %v2558_v6  ;;  %v931_v14 = vsel %vm929_vm2, %v930_v11, 0  ;;  %v2556_v17 = vld [vmem:[%s2734_s28] ss:$8 sps:$4 sm:$0xff]  }
  0x11   : > { %2160 = vmatprep.mubr.msk.bf16.mxu1 %vm831_vm0, %v2561_v7  ;;  %v933_v15 = vand.u32 %v2554_v13, %v931_v14  ;;  %v2555_v16 = vld [vmem:[%s3036_s1 + $0x40] sm:$0xff]   ;;  %v2562_v19 = vld [vmem:[%s2734_s28 + $0x14] ss:$8 sps:$4 sm:$0xff]   ;;  %v2566_v21 = vld [vmem:[%s2734_s28 + $0x10] ss:$8 sps:$4 sm:$0xff]  }
  0x12   : > { %938 = vmatpush1.bf16.msra.mxu0 %v2547_v2  ;;  %2511 = vmatpush1.bf16.msra.mxu1 %v2547_v2  ;;  %v2559_v18 = vld [vmem:[%s2734_s28 + $0x100] ss:$8 sps:$4 sm:$0xff]   ;;  %v2564_v20 = vld [vmem:[%s2734_s28 + $0x114] ss:$8 sps:$4 sm:$0xff]   ;;  %v2567_v22 = vld [vmem:[%s2734_s28 + $0x110] ss:$8 sps:$4 sm:$0xff]  }
  0x13   : > { %939 = vmatprep.subr.bf16.mxu0 %v2676_v1  ;;  %2502 = vmatprep.subr.bf16.mxu1 %v2676_v1  ;;  %v2568_v23 = vld [vmem:[%s2734_s28 + $0x24] ss:$8 sps:$4 sm:$0xff]   ;;  %v2572_v25 = vld [vmem:[%s2734_s28 + $0x20] ss:$8 sps:$4 sm:$0xff]   ;;  %v2574_v27 = vld [vmem:[%s2734_s28 + $0x34] ss:$8 sps:$4 sm:$0xff]  }
  0x14   : > { %v2570_v24 = vld [vmem:[%s2734_s28 + $0x124] ss:$8 sps:$4 sm:$0xff]   ;;  %v2573_v26 = vld [vmem:[%s2734_s28 + $0x120] ss:$8 sps:$4 sm:$0xff]   ;;  %v2576_v28 = vld [vmem:[%s2734_s28 + $0x134] ss:$8 sps:$4 sm:$0xff]  }
  0x15   : > { %v2578_v29 = vld [vmem:[%s2734_s28 + $0x30] ss:$8 sps:$4 sm:$0xff]   ;;  %v2580_v31 = vld [vmem:[%s2734_s28 + $0x44] ss:$8 sps:$4 sm:$0xff]   ;;  %v2584_v33 = vld [vmem:[%s2734_s28 + $0x40] ss:$8 sps:$4 sm:$0xff]  }
  0x16   : > { %940 = vmatpush1.bf16.msra.mxu0 %v2548_v3  ;;  %2512 = vmatpush1.bf16.msra.mxu1 %v2548_v3  ;;  %v2579_v30 = vld [vmem:[%s2734_s28 + $0x130] ss:$8 sps:$4 sm:$0xff]   ;;  %v2582_v32 = vld [vmem:[%s2734_s28 + $0x144] ss:$8 sps:$4 sm:$0xff]   ;;  %v2585_v34 = vld [vmem:[%s2734_s28 + $0x140] ss:$8 sps:$4 sm:$0xff]  }
  0x17   : > { %941 = vmatprep.subr.bf16.mxu0 %v2676_v1  ;;  %2503 = vmatprep.subr.bf16.mxu1 %v2676_v1  ;;  %v2586_v35 = vld [vmem:[%s2734_s28 + $0x54] ss:$8 sps:$4 sm:$0xff]   ;;  %v2590_v37 = vld [vmem:[%s2734_s28 + $0x50] ss:$8 sps:$4 sm:$0xff]   ;;  %v2592_v39 = vld [vmem:[%s2734_s28 + $0x64] ss:$8 sps:$4 sm:$0xff]  }
  0x18   : > { %v2588_v36 = vld [vmem:[%s2734_s28 + $0x154] ss:$8 sps:$4 sm:$0xff]   ;;  %v2591_v38 = vld [vmem:[%s2734_s28 + $0x150] ss:$8 sps:$4 sm:$0xff]   ;;  %v2594_v40 = vld [vmem:[%s2734_s28 + $0x164] ss:$8 sps:$4 sm:$0xff]  }
  0x19   : > { %v2596_v41 = vld [vmem:[%s2734_s28 + $0x60] ss:$8 sps:$4 sm:$0xff]   ;;  %v2598_v43 = vld [vmem:[%s2734_s28 + $0x74] ss:$8 sps:$4 sm:$0xff]   ;;  %v2602_v45 = vld [vmem:[%s2734_s28 + $0x70] ss:$8 sps:$4 sm:$0xff]  }
  0x1a   : > { %942 = vmatpush1.bf16.msra.mxu0 %v2549_v4  ;;  %2513 = vmatpush1.bf16.msra.mxu1 %v2549_v4  ;;  %v2597_v42 = vld [vmem:[%s2734_s28 + $0x160] ss:$8 sps:$4 sm:$0xff]   ;;  %v2600_v44 = vld [vmem:[%s2734_s28 + $0x174] ss:$8 sps:$4 sm:$0xff]   ;;  %v2603_v46 = vld [vmem:[%s2734_s28 + $0x170] ss:$8 sps:$4 sm:$0xff]  }
  0x1b   : > { %943 = vmatprep.subr.bf16.mxu0 %v2676_v1  ;;  %2504 = vmatprep.subr.bf16.mxu1 %v2676_v1  ;;  %v2604_v47 = vld [vmem:[%s2734_s28 + $0x84] ss:$8 sps:$4 sm:$0xff]   ;;  %v2608_v49 = vld [vmem:[%s2734_s28 + $0x80] ss:$8 sps:$4 sm:$0xff]   ;;  %v2610_v51 = vld [vmem:[%s2734_s28 + $0x94] ss:$8 sps:$4 sm:$0xff]  }
  0x1c   : > { %v2606_v48 = vld [vmem:[%s2734_s28 + $0x184] ss:$8 sps:$4 sm:$0xff]   ;;  %v2609_v50 = vld [vmem:[%s2734_s28 + $0x180] ss:$8 sps:$4 sm:$0xff]   ;;  %v2612_v52 = vld [vmem:[%s2734_s28 + $0x194] ss:$8 sps:$4 sm:$0xff]  }
  0x1d   : > { %v2614_v53 = vld [vmem:[%s2734_s28 + $0x90] ss:$8 sps:$4 sm:$0xff]   ;;  %v2616_v55 = vld [vmem:[%s2734_s28 + $0xa4] ss:$8 sps:$4 sm:$0xff]   ;;  %v2620_v57 = vld [vmem:[%s2734_s28 + $0xa0] ss:$8 sps:$4 sm:$0xff]  }
  0x1e   : > { %944 = vmatpush1.bf16.msra.mxu0 %v2550_v5  ;;  %2514 = vmatpush1.bf16.msra.mxu1 %v2550_v5  ;;  %v2615_v54 = vld [vmem:[%s2734_s28 + $0x190] ss:$8 sps:$4 sm:$0xff]   ;;  %v2618_v56 = vld [vmem:[%s2734_s28 + $0x1a4] ss:$8 sps:$4 sm:$0xff]   ;;  %v2621_v58 = vld [vmem:[%s2734_s28 + $0x1a0] ss:$8 sps:$4 sm:$0xff]  }
  0x1f   : > { %945 = vmatprep.subr.bf16.mxu0 %v2676_v1  ;;  %2505 = vmatprep.subr.bf16.mxu1 %v2676_v1  ;;  %v2622_v59 = vld [vmem:[%s2734_s28 + $0xb4] ss:$8 sps:$4 sm:$0xff]   ;;  %v2626_v61 = vld [vmem:[%s2734_s28 + $0xb0] ss:$8 sps:$4 sm:$0xff]   ;;  %v2628_v63 = vld [vmem:[%s2734_s28 + $0xc4] ss:$8 sps:$4 sm:$0xff]  }
  0x20   : > { %v2624_v60 = vld [vmem:[%s2734_s28 + $0x1b4] ss:$8 sps:$4 sm:$0xff]   ;;  %v2627_v62 = vld [vmem:[%s2734_s28 + $0x1b0] ss:$8 sps:$4 sm:$0xff]   ;;  %v2630_v0 = vld [vmem:[%s2734_s28 + $0x1c4] ss:$8 sps:$4 sm:$0xff]  }
  0x21   : > { %v2633_v2 = vld [vmem:[%s2734_s28 + $0x1c0] ss:$8 sps:$4 sm:$0xff]   ;;  %v2634_v3 = vld [vmem:[%s2734_s28 + $0xd4] ss:$8 sps:$4 sm:$0xff]   ;;  %v2638_v5 = vld [vmem:[%s2734_s28 + $0xd0] ss:$8 sps:$4 sm:$0xff]  }
  0x22   : > { %946 = vmatpush1.bf16.msra.mxu0 %v2551_v8  ;;  %2515 = vmatpush1.bf16.msra.mxu1 %v2551_v8  ;;  %v2636_v4 = vld [vmem:[%s2734_s28 + $0x1d4] ss:$8 sps:$4 sm:$0xff]   ;;  %v2639_v6 = vld [vmem:[%s2734_s28 + $0x1d0] ss:$8 sps:$4 sm:$0xff]   ;;  %v2640_v7 = vld [vmem:[%s2734_s28 + $0xe4] ss:$8 sps:$4 sm:$0xff]  }
  0x23   : > { %947 = vmatprep.subr.bf16.mxu0 %v2676_v1  ;;  %2506 = vmatprep.subr.bf16.mxu1 %v2676_v1  ;;  %v2642_v8 = vld [vmem:[%s2734_s28 + $0x1e4] ss:$8 sps:$4 sm:$0xff]   ;;  %v2645_v10 = vld [vmem:[%s2734_s28 + $0x1e0] ss:$8 sps:$4 sm:$0xff]   ;;  %v2646_v11 = vld [vmem:[%s2734_s28 + $0xf4] ss:$8 sps:$4 sm:$0xff]  }
  0x24   : > { %v2650_v13 = vld [vmem:[%s2734_s28 + $0xf0] ss:$8 sps:$4 sm:$0xff]  }
  0x25   : > { %v2651_v14 = vld [vmem:[%s2734_s28 + $0x1f0] ss:$8 sps:$4 sm:$0xff]  }
  0x26   : > { %948 = vmatpush1.bf16.msra.mxu0 %v2552_v9  ;;  %2516 = vmatpush1.bf16.msra.mxu1 %v2552_v9  ;;  %v2644_v9 = vld [vmem:[%s2734_s28 + $0xe0] ss:$8 sps:$4 sm:$0xff]  }
  0x27   : > { %949 = vmatprep.subr.bf16.mxu0 %v2676_v1  ;;  %2507 = vmatprep.subr.bf16.mxu1 %v2676_v1 }
  0x2a   : > { %950 = vmatpush1.bf16.msra.mxu0 %v2553_v12  ;;  %2517 = vmatpush1.bf16.msra.mxu1 %v2553_v12  ;;  %v2648_v12 = vld [vmem:[%s2734_s28 + $0x1f4] ss:$8 sps:$4 sm:$0xff]  }
  0x2b   : > { %963 = vmatprep.subr.bf16.mxu0 %v2676_v1  ;;  %2508 = vmatprep.subr.bf16.mxu1 %v2676_v1 }
  0x2e   : > { %964 = vmatpush2.bf16.msra.mxu0 %v933_v15  ;;  %2518 = vmatpush2.bf16.msra.mxu1 %v933_v15  ;;  %v2853_v15 = vld [vmem:[%s3037_s2] ss:$0 sm:$0xff] }
  0x2f   : > { %965 = vmatprep.subr.bf16.mxu0 %v2676_v1  ;;  %2509 = vmatprep.subr.bf16.mxu1 %v2676_v1  ;;  %v2632_v1 = vld [vmem:[%s2734_s28 + $0xc0] ss:$8 sps:$4 sm:$0xff]  }
  0x32   : > { %966 = vmatpush2.bf16.msra.mxu0 %v2555_v16  ;;  %2519 = vmatpush2.bf16.msra.mxu1 %v2555_v16 }
  0x35   : > { %968 = vmatmul.mubr.bf16.vlgmr.msra.gmra.mxu0 %v2556_v17  ;;  %1096 = vmatmul.mubr.bf16.vlgmr.msra.gmra.mxu1 %v2559_v18 }
  0x36   : > { %2145 = vmatprep.mubr.msk.bf16.mxu0 %vm831_vm0, %v2562_v19  ;;  %2161 = vmatprep.mubr.msk.bf16.mxu1 %vm831_vm0, %v2564_v20  ;;  %v2859_v19 = vld [vmem:[%s3037_s2 + $0x1] ss:$0 sm:$0xff] }
  0x3d   : > { %976 = vmatmul.mubr.bf16.gmra.mxu0 %v2566_v21  ;;  %1104 = vmatmul.mubr.bf16.gmra.mxu1 %v2567_v22 }
  0x3e   : > { %2146 = vmatprep.mubr.msk.bf16.mxu0 %vm831_vm0, %v2568_v23  ;;  %2162 = vmatprep.mubr.msk.bf16.mxu1 %vm831_vm0, %v2570_v24 }
  0x45   : > { %984 = vmatmul.mubr.bf16.gmra.mxu0 %v2572_v25  ;;  %1112 = vmatmul.mubr.bf16.gmra.mxu1 %v2573_v26 }
  0x46   : > { %2147 = vmatprep.mubr.msk.bf16.mxu0 %vm831_vm0, %v2574_v27  ;;  %2163 = vmatprep.mubr.msk.bf16.mxu1 %vm831_vm0, %v2576_v28 }
  0x4d   : > { %992 = vmatmul.mubr.bf16.gmra.mxu0 %v2578_v29  ;;  %1120 = vmatmul.mubr.bf16.gmra.mxu1 %v2579_v30 }
  0x4e   : > { %2148 = vmatprep.mubr.msk.bf16.mxu0 %vm831_vm0, %v2580_v31  ;;  %2164 = vmatprep.mubr.msk.bf16.mxu1 %vm831_vm0, %v2582_v32 }
  0x55   : > { %1000 = vmatmul.mubr.bf16.gmra.mxu0 %v2584_v33  ;;  %1128 = vmatmul.mubr.bf16.gmra.mxu1 %v2585_v34 }
  0x56   : > { %2149 = vmatprep.mubr.msk.bf16.mxu0 %vm831_vm0, %v2586_v35  ;;  %2165 = vmatprep.mubr.msk.bf16.mxu1 %vm831_vm0, %v2588_v36 }
  0x5d   : > { %1008 = vmatmul.mubr.bf16.gmra.mxu0 %v2590_v37  ;;  %1136 = vmatmul.mubr.bf16.gmra.mxu1 %v2591_v38 }
  0x5e   : > { %2150 = vmatprep.mubr.msk.bf16.mxu0 %vm831_vm0, %v2592_v39  ;;  %2166 = vmatprep.mubr.msk.bf16.mxu1 %vm831_vm0, %v2594_v40 }
  0x65   : > { %1016 = vmatmul.mubr.bf16.gmra.mxu0 %v2596_v41  ;;  %1144 = vmatmul.mubr.bf16.gmra.mxu1 %v2597_v42 }
  0x66   : > { %2151 = vmatprep.mubr.msk.bf16.mxu0 %vm831_vm0, %v2598_v43  ;;  %2167 = vmatprep.mubr.msk.bf16.mxu1 %vm831_vm0, %v2600_v44 }
  0x6d   : > { %1024 = vmatmul.mubr.bf16.gmra.mxu0 %v2602_v45  ;;  %1152 = vmatmul.mubr.bf16.gmra.mxu1 %v2603_v46 }
  0x6e   : > { %2152 = vmatprep.mubr.msk.bf16.mxu0 %vm831_vm0, %v2604_v47  ;;  %2168 = vmatprep.mubr.msk.bf16.mxu1 %vm831_vm0, %v2606_v48 }
  0x75   : > { %1032 = vmatmul.mubr.bf16.gmra.mxu0 %v2608_v49  ;;  %1160 = vmatmul.mubr.bf16.gmra.mxu1 %v2609_v50 }
  0x76   : > { %2153 = vmatprep.mubr.msk.bf16.mxu0 %vm831_vm0, %v2610_v51  ;;  %2169 = vmatprep.mubr.msk.bf16.mxu1 %vm831_vm0, %v2612_v52 }
  0x7d   : > { %1040 = vmatmul.mubr.bf16.gmra.mxu0 %v2614_v53  ;;  %1168 = vmatmul.mubr.bf16.gmra.mxu1 %v2615_v54 }
  0x7e   : > { %2154 = vmatprep.mubr.msk.bf16.mxu0 %vm831_vm0, %v2616_v55  ;;  %2170 = vmatprep.mubr.msk.bf16.mxu1 %vm831_vm0, %v2618_v56 }
  0x85   : > { %1048 = vmatmul.mubr.bf16.gmra.mxu0 %v2620_v57  ;;  %1176 = vmatmul.mubr.bf16.gmra.mxu1 %v2621_v58 }
  0x86   : > { %2155 = vmatprep.mubr.msk.bf16.mxu0 %vm831_vm0, %v2622_v59  ;;  %2171 = vmatprep.mubr.msk.bf16.mxu1 %vm831_vm0, %v2624_v60 }
  0x8d   : > { %1056 = vmatmul.mubr.bf16.gmra.mxu0 %v2626_v61  ;;  %1184 = vmatmul.mubr.bf16.gmra.mxu1 %v2627_v62 }
  0x8e   : > { %2156 = vmatprep.mubr.msk.bf16.mxu0 %vm831_vm0, %v2628_v63  ;;  %2172 = vmatprep.mubr.msk.bf16.mxu1 %vm831_vm0, %v2630_v0 }
  0x95   : > { %1064 = vmatmul.mubr.bf16.gmra.mxu0 %v2632_v1  ;;  %1192 = vmatmul.mubr.bf16.gmra.mxu1 %v2633_v2 }
  0x96   : > { %2157 = vmatprep.mubr.msk.bf16.mxu0 %vm831_vm0, %v2634_v3  ;;  %2173 = vmatprep.mubr.msk.bf16.mxu1 %vm831_vm0, %v2636_v4 }
  0x9d   : > { %1072 = vmatmul.mubr.bf16.gmra.mxu0 %v2638_v5  ;;  %1200 = vmatmul.mubr.bf16.gmra.mxu1 %v2639_v6 }
  0x9e   : > { %2158 = vmatprep.mubr.msk.bf16.mxu0 %vm831_vm0, %v2640_v7  ;;  %2174 = vmatprep.mubr.msk.bf16.mxu1 %vm831_vm0, %v2642_v8 }
  0xa5   : > { %1080 = vmatmul.mubr.bf16.gmra.mxu0 %v2644_v9  ;;  %1208 = vmatmul.mubr.bf16.gmra.mxu1 %v2645_v10 }
  0xa6   : > { %2159 = vmatprep.mubr.msk.bf16.mxu0 %vm831_vm0, %v2646_v11  ;;  %2175 = vmatprep.mubr.msk.bf16.mxu1 %vm831_vm0, %v2648_v12 }
  0xad   : > { %1088 = vmatmul.mubr.bf16.gmra.mxu0 %v2650_v13  ;;  %1216 = vmatmul.mubr.bf16.gmra.mxu1 %v2651_v14 }
  0xf5   : > { %v969_v16 = vpop.f32.mrf.mxu0  ;;  %v1097_v17 = vpop.f32.mrf.mxu1 }
  0xf6   : > { %v1424_v18 = vmul.f32 %v2853_v15, %v969_v16  ;;  %v1456_v20 = vmul.f32 %v2853_v15, %v1097_v17 }
  0xf7   : > { %v971_v21 = vpop.f32.mrf.mxu0  ;;  %v1099_v22 = vpop.f32.mrf.mxu1 }
  0xf8   : > { %v1493_v23 = vadd.f32 %v2859_v19, %v1424_v18  ;;  %v1525_v24 = vadd.f32 %v2859_v19, %v1456_v20 }
  0xf9   : > { %v972_v25 = vpop.f32.mrf.mxu0  ;;  %v1100_v26 = vpop.f32.mrf.mxu1 }
  0xfa   : > { %v1425_v27 = vmul.f32 %v2853_v15, %v972_v25  ;;  %v1457_v28 = vmul.f32 %v2853_v15, %v1100_v26  ;;  %v1557_v33 = vmax.f32 %v1493_v23, 0.0  ;;  %v1589_v34 = vmax.f32 %v1525_v24, 0.0 }
  0xfb   : > { %v974_v29 = vpop.f32.mrf.mxu0  ;;  %v1102_v30 = vpop.f32.mrf.mxu1 }
  0xfc   : > { %v1494_v31 = vadd.f32 %v2859_v19, %v1425_v27  ;;  %v1526_v32 = vadd.f32 %v2859_v19, %v1457_v28 }
  0xfd   : > { %v977_v35 = vpop.f32.mrf.mxu0  ;;  %v1105_v36 = vpop.f32.mrf.mxu1 }
  0xfe   : > { %v1558_v37 = vmax.f32 %v1494_v31, 0.0  ;;  %v1590_v38 = vmax.f32 %v1526_v32, 0.0  ;;  %v1426_v39 = vmul.f32 %v2853_v15, %v977_v35  ;;  %v1458_v40 = vmul.f32 %v2853_v15, %v1105_v36 }
  0xff   : > { %v979_v41 = vpop.f32.mrf.mxu0  ;;  %v1107_v42 = vpop.f32.mrf.mxu1 }
 0x100   : > { %v2312_v43 = vpack.c.bf16 %v1558_v37, %v1557_v33  ;;  %v2392_v44 = vpack.c.bf16 %v1590_v38, %v1589_v34  ;;  %v1495_v45 = vadd.f32 %v2859_v19, %v1426_v39  ;;  %v1527_v46 = vadd.f32 %v2859_v19, %v1458_v40 }
 0x101   : > { %v980_v47 = vpop.f32.mrf.mxu0  ;;  %v1108_v48 = vpop.f32.mrf.mxu1 }
 0x102   : > { %2313 = vst [vmem:[%s2874_s25] sm:$0xff] %v2312_v43   ;;  %2484 = vst [vmem:[%s2874_s25 + $0x80] sm:$0xff] %v2392_v44   ;;  %v1427_v49 = vmul.f32 %v2853_v15, %v980_v47  ;;  %v1459_v50 = vmul.f32 %v2853_v15, %v1108_v48  ;;  %v1559_v55 = vmax.f32 %v1495_v45, 0.0  ;;  %v1591_v56 = vmax.f32 %v1527_v46, 0.0 }
 0x103   : > { %v982_v51 = vpop.f32.mrf.mxu0  ;;  %v1110_v52 = vpop.f32.mrf.mxu1 }
 0x104   : > { %v1496_v53 = vadd.f32 %v2859_v19, %v1427_v49  ;;  %v1528_v54 = vadd.f32 %v2859_v19, %v1459_v50 }
 0x105   : > { %v985_v57 = vpop.f32.mrf.mxu0  ;;  %v1113_v58 = vpop.f32.mrf.mxu1 }
 0x106   : > { %v1560_v59 = vmax.f32 %v1496_v53, 0.0  ;;  %v1592_v60 = vmax.f32 %v1528_v54, 0.0  ;;  %v1428_v61 = vmul.f32 %v2853_v15, %v985_v57  ;;  %v1460_v62 = vmul.f32 %v2853_v15, %v1113_v58 }
 0x107   : > { %v987_v63 = vpop.f32.mrf.mxu0  ;;  %v1115_v0 = vpop.f32.mrf.mxu1 }
 0x108   : > { %v2317_v1 = vpack.c.bf16 %v1560_v59, %v1559_v55  ;;  %v2397_v2 = vpack.c.bf16 %v1592_v60, %v1591_v56  ;;  %v1497_v3 = vadd.f32 %v2859_v19, %v1428_v61  ;;  %v1529_v4 = vadd.f32 %v2859_v19, %v1460_v62 }
 0x109   : > { %v988_v5 = vpop.f32.mrf.mxu0  ;;  %v1116_v6 = vpop.f32.mrf.mxu1 }
 0x10a   : > { %2469 = vst [vmem:[%s2874_s25 + $0x8] sm:$0xff] %v2317_v1   ;;  %2485 = vst [vmem:[%s2874_s25 + $0x88] sm:$0xff] %v2397_v2   ;;  %v1429_v7 = vmul.f32 %v2853_v15, %v988_v5  ;;  %v1461_v8 = vmul.f32 %v2853_v15, %v1116_v6  ;;  %v1561_v13 = vmax.f32 %v1497_v3, 0.0  ;;  %v1593_v14 = vmax.f32 %v1529_v4, 0.0 }
 0x10b   : > { %v990_v9 = vpop.f32.mrf.mxu0  ;;  %v1118_v10 = vpop.f32.mrf.mxu1 }
 0x10c   : > { %v1498_v11 = vadd.f32 %v2859_v19, %v1429_v7  ;;  %v1530_v12 = vadd.f32 %v2859_v19, %v1461_v8 }
 0x10d   : > { %v993_v16 = vpop.f32.mrf.mxu0  ;;  %v1121_v17 = vpop.f32.mrf.mxu1 }
 0x10e   : > { %v1562_v18 = vmax.f32 %v1498_v11, 0.0  ;;  %v1594_v20 = vmax.f32 %v1530_v12, 0.0  ;;  %v1430_v21 = vmul.f32 %v2853_v15, %v993_v16  ;;  %v1462_v22 = vmul.f32 %v2853_v15, %v1121_v17 }
 0x10f   : > { %v995_v23 = vpop.f32.mrf.mxu0  ;;  %v1123_v24 = vpop.f32.mrf.mxu1 }
 0x110   : > { %v2322_v25 = vpack.c.bf16 %v1562_v18, %v1561_v13  ;;  %v2402_v26 = vpack.c.bf16 %v1594_v20, %v1593_v14  ;;  %v1499_v27 = vadd.f32 %v2859_v19, %v1430_v21  ;;  %v1531_v28 = vadd.f32 %v2859_v19, %v1462_v22 }
 0x111   : > { %v996_v29 = vpop.f32.mrf.mxu0  ;;  %v1124_v30 = vpop.f32.mrf.mxu1 }
 0x112   : > { %2470 = vst [vmem:[%s2874_s25 + $0x10] sm:$0xff] %v2322_v25   ;;  %2486 = vst [vmem:[%s2874_s25 + $0x90] sm:$0xff] %v2402_v26   ;;  %v1431_v31 = vmul.f32 %v2853_v15, %v996_v29  ;;  %v1463_v32 = vmul.f32 %v2853_v15, %v1124_v30  ;;  %v1563_v37 = vmax.f32 %v1499_v27, 0.0  ;;  %v1595_v38 = vmax.f32 %v1531_v28, 0.0 }
 0x113   : > { %v998_v33 = vpop.f32.mrf.mxu0  ;;  %v1126_v34 = vpop.f32.mrf.mxu1 }
 0x114   : > { %v1500_v35 = vadd.f32 %v2859_v19, %v1431_v31  ;;  %v1532_v36 = vadd.f32 %v2859_v19, %v1463_v32 }
 0x115   : > { %v1001_v39 = vpop.f32.mrf.mxu0  ;;  %v1129_v40 = vpop.f32.mrf.mxu1 }
 0x116   : > { %v1564_v41 = vmax.f32 %v1500_v35, 0.0  ;;  %v1596_v42 = vmax.f32 %v1532_v36, 0.0  ;;  %v1432_v43 = vmul.f32 %v2853_v15, %v1001_v39  ;;  %v1464_v44 = vmul.f32 %v2853_v15, %v1129_v40 }
 0x117   : > { %v1003_v45 = vpop.f32.mrf.mxu0  ;;  %v1131_v46 = vpop.f32.mrf.mxu1 }
 0x118   : > { %v2327_v47 = vpack.c.bf16 %v1564_v41, %v1563_v37  ;;  %v2407_v48 = vpack.c.bf16 %v1596_v42, %v1595_v38  ;;  %v1501_v49 = vadd.f32 %v2859_v19, %v1432_v43  ;;  %v1533_v50 = vadd.f32 %v2859_v19, %v1464_v44 }
 0x119   : > { %v1004_v51 = vpop.f32.mrf.mxu0  ;;  %v1132_v52 = vpop.f32.mrf.mxu1 }
 0x11a   : > { %2471 = vst [vmem:[%s2874_s25 + $0x18] sm:$0xff] %v2327_v47   ;;  %2487 = vst [vmem:[%s2874_s25 + $0x98] sm:$0xff] %v2407_v48   ;;  %v1433_v53 = vmul.f32 %v2853_v15, %v1004_v51  ;;  %v1465_v54 = vmul.f32 %v2853_v15, %v1132_v52  ;;  %v1565_v59 = vmax.f32 %v1501_v49, 0.0  ;;  %v1597_v60 = vmax.f32 %v1533_v50, 0.0 }
 0x11b   : > { %v1006_v55 = vpop.f32.mrf.mxu0  ;;  %v1134_v56 = vpop.f32.mrf.mxu1 }
 0x11c   : > { %v1502_v57 = vadd.f32 %v2859_v19, %v1433_v53  ;;  %v1534_v58 = vadd.f32 %v2859_v19, %v1465_v54 }
 0x11d   : > { %v1009_v61 = vpop.f32.mrf.mxu0  ;;  %v1137_v62 = vpop.f32.mrf.mxu1 }
 0x11e   : > { %v1566_v63 = vmax.f32 %v1502_v57, 0.0  ;;  %v1598_v0 = vmax.f32 %v1534_v58, 0.0  ;;  %v1434_v1 = vmul.f32 %v2853_v15, %v1009_v61  ;;  %v1466_v2 = vmul.f32 %v2853_v15, %v1137_v62 }
 0x11f   : > { %v1011_v3 = vpop.f32.mrf.mxu0  ;;  %v1139_v4 = vpop.f32.mrf.mxu1 }
 0x120   : > { %v2332_v5 = vpack.c.bf16 %v1566_v63, %v1565_v59  ;;  %v2412_v6 = vpack.c.bf16 %v1598_v0, %v1597_v60  ;;  %v1503_v7 = vadd.f32 %v2859_v19, %v1434_v1  ;;  %v1535_v8 = vadd.f32 %v2859_v19, %v1466_v2 }
 0x121   : > { %v1012_v9 = vpop.f32.mrf.mxu0  ;;  %v1140_v10 = vpop.f32.mrf.mxu1 }
 0x122   : > { %2472 = vst [vmem:[%s2874_s25 + $0x20] sm:$0xff] %v2332_v5   ;;  %2488 = vst [vmem:[%s2874_s25 + $0xa0] sm:$0xff] %v2412_v6   ;;  %v1435_v11 = vmul.f32 %v2853_v15, %v1012_v9  ;;  %v1467_v12 = vmul.f32 %v2853_v15, %v1140_v10  ;;  %v1567_v18 = vmax.f32 %v1503_v7, 0.0  ;;  %v1599_v20 = vmax.f32 %v1535_v8, 0.0 }
 0x123   : > { %v1014_v13 = vpop.f32.mrf.mxu0  ;;  %v1142_v14 = vpop.f32.mrf.mxu1 }
 0x124   : > { %v1504_v16 = vadd.f32 %v2859_v19, %v1435_v11  ;;  %v1536_v17 = vadd.f32 %v2859_v19, %v1467_v12 }
 0x125   : > { %v1017_v21 = vpop.f32.mrf.mxu0  ;;  %v1145_v22 = vpop.f32.mrf.mxu1 }
 0x126   : > { %v1568_v23 = vmax.f32 %v1504_v16, 0.0  ;;  %v1600_v24 = vmax.f32 %v1536_v17, 0.0  ;;  %v1436_v25 = vmul.f32 %v2853_v15, %v1017_v21  ;;  %v1468_v26 = vmul.f32 %v2853_v15, %v1145_v22 }
 0x127   : > { %v1019_v27 = vpop.f32.mrf.mxu0  ;;  %v1147_v28 = vpop.f32.mrf.mxu1 }
 0x128   : > { %v2337_v29 = vpack.c.bf16 %v1568_v23, %v1567_v18  ;;  %v2417_v30 = vpack.c.bf16 %v1600_v24, %v1599_v20  ;;  %v1505_v31 = vadd.f32 %v2859_v19, %v1436_v25  ;;  %v1537_v32 = vadd.f32 %v2859_v19, %v1468_v26 }
 0x129   : > { %v1020_v33 = vpop.f32.mrf.mxu0  ;;  %v1148_v34 = vpop.f32.mrf.mxu1 }
 0x12a   : > { %2473 = vst [vmem:[%s2874_s25 + $0x28] sm:$0xff] %v2337_v29   ;;  %2489 = vst [vmem:[%s2874_s25 + $0xa8] sm:$0xff] %v2417_v30   ;;  %v1437_v35 = vmul.f32 %v2853_v15, %v1020_v33  ;;  %v1469_v36 = vmul.f32 %v2853_v15, %v1148_v34  ;;  %v1569_v41 = vmax.f32 %v1505_v31, 0.0  ;;  %v1601_v42 = vmax.f32 %v1537_v32, 0.0 }
 0x12b   : > { %v1022_v37 = vpop.f32.mrf.mxu0  ;;  %v1150_v38 = vpop.f32.mrf.mxu1 }
 0x12c   : > { %v1506_v39 = vadd.f32 %v2859_v19, %v1437_v35  ;;  %v1538_v40 = vadd.f32 %v2859_v19, %v1469_v36 }
 0x12d   : > { %v1025_v43 = vpop.f32.mrf.mxu0  ;;  %v1153_v44 = vpop.f32.mrf.mxu1 }
 0x12e   : > { %v1570_v45 = vmax.f32 %v1506_v39, 0.0  ;;  %v1602_v46 = vmax.f32 %v1538_v40, 0.0  ;;  %v1438_v47 = vmul.f32 %v2853_v15, %v1025_v43  ;;  %v1470_v48 = vmul.f32 %v2853_v15, %v1153_v44 }
 0x12f   : > { %v1027_v49 = vpop.f32.mrf.mxu0  ;;  %v1155_v50 = vpop.f32.mrf.mxu1 }
 0x130   : > { %v2342_v51 = vpack.c.bf16 %v1570_v45, %v1569_v41  ;;  %v2422_v52 = vpack.c.bf16 %v1602_v46, %v1601_v42  ;;  %v1507_v53 = vadd.f32 %v2859_v19, %v1438_v47  ;;  %v1539_v54 = vadd.f32 %v2859_v19, %v1470_v48 }
 0x131   : > { %v1028_v55 = vpop.f32.mrf.mxu0  ;;  %v1156_v56 = vpop.f32.mrf.mxu1 }
 0x132   : > { %2474 = vst [vmem:[%s2874_s25 + $0x30] sm:$0xff] %v2342_v51   ;;  %2490 = vst [vmem:[%s2874_s25 + $0xb0] sm:$0xff] %v2422_v52   ;;  %v1439_v57 = vmul.f32 %v2853_v15, %v1028_v55  ;;  %v1471_v58 = vmul.f32 %v2853_v15, %v1156_v56  ;;  %v1571_v63 = vmax.f32 %v1507_v53, 0.0  ;;  %v1603_v0 = vmax.f32 %v1539_v54, 0.0 }
 0x133   : > { %v1030_v59 = vpop.f32.mrf.mxu0  ;;  %v1158_v60 = vpop.f32.mrf.mxu1 }
 0x134   : > { %v1508_v61 = vadd.f32 %v2859_v19, %v1439_v57  ;;  %v1540_v62 = vadd.f32 %v2859_v19, %v1471_v58 }
 0x135   : > { %v1033_v1 = vpop.f32.mrf.mxu0  ;;  %v1161_v2 = vpop.f32.mrf.mxu1 }
 0x136   : > { %v1572_v3 = vmax.f32 %v1508_v61, 0.0  ;;  %v1604_v4 = vmax.f32 %v1540_v62, 0.0  ;;  %v1440_v5 = vmul.f32 %v2853_v15, %v1033_v1  ;;  %v1472_v6 = vmul.f32 %v2853_v15, %v1161_v2 }
 0x137   : > { %v1035_v7 = vpop.f32.mrf.mxu0  ;;  %v1163_v8 = vpop.f32.mrf.mxu1 }
 0x138   : > { %v2347_v9 = vpack.c.bf16 %v1572_v3, %v1571_v63  ;;  %v2427_v10 = vpack.c.bf16 %v1604_v4, %v1603_v0  ;;  %v1509_v11 = vadd.f32 %v2859_v19, %v1440_v5  ;;  %v1541_v12 = vadd.f32 %v2859_v19, %v1472_v6 }
 0x139   : > { %v1036_v13 = vpop.f32.mrf.mxu0  ;;  %v1164_v14 = vpop.f32.mrf.mxu1 }
 0x13a   : > { %2475 = vst [vmem:[%s2874_s25 + $0x38] sm:$0xff] %v2347_v9   ;;  %2491 = vst [vmem:[%s2874_s25 + $0xb8] sm:$0xff] %v2427_v10   ;;  %v1441_v16 = vmul.f32 %v2853_v15, %v1036_v13  ;;  %v1473_v17 = vmul.f32 %v2853_v15, %v1164_v14  ;;  %v1573_v23 = vmax.f32 %v1509_v11, 0.0  ;;  %v1605_v24 = vmax.f32 %v1541_v12, 0.0 }
 0x13b   : > { %v1038_v18 = vpop.f32.mrf.mxu0  ;;  %v1166_v20 = vpop.f32.mrf.mxu1 }
 0x13c   : > { %v1510_v21 = vadd.f32 %v2859_v19, %v1441_v16  ;;  %v1542_v22 = vadd.f32 %v2859_v19, %v1473_v17 }
 0x13d   : > { %v1041_v25 = vpop.f32.mrf.mxu0  ;;  %v1169_v26 = vpop.f32.mrf.mxu1 }
 0x13e   : > { %v1574_v27 = vmax.f32 %v1510_v21, 0.0  ;;  %v1606_v28 = vmax.f32 %v1542_v22, 0.0  ;;  %v1442_v29 = vmul.f32 %v2853_v15, %v1041_v25  ;;  %v1474_v30 = vmul.f32 %v2853_v15, %v1169_v26 }
 0x13f   : > { %v1043_v31 = vpop.f32.mrf.mxu0  ;;  %v1171_v32 = vpop.f32.mrf.mxu1 }
 0x140   : > { %v2352_v33 = vpack.c.bf16 %v1574_v27, %v1573_v23  ;;  %v2432_v34 = vpack.c.bf16 %v1606_v28, %v1605_v24  ;;  %v1511_v35 = vadd.f32 %v2859_v19, %v1442_v29  ;;  %v1543_v36 = vadd.f32 %v2859_v19, %v1474_v30 }
 0x141   : > { %v1044_v37 = vpop.f32.mrf.mxu0  ;;  %v1172_v38 = vpop.f32.mrf.mxu1 }
 0x142   : > { %2476 = vst [vmem:[%s2874_s25 + $0x40] sm:$0xff] %v2352_v33   ;;  %2492 = vst [vmem:[%s2874_s25 + $0xc0] sm:$0xff] %v2432_v34   ;;  %v1443_v39 = vmul.f32 %v2853_v15, %v1044_v37  ;;  %v1475_v40 = vmul.f32 %v2853_v15, %v1172_v38  ;;  %v1575_v45 = vmax.f32 %v1511_v35, 0.0  ;;  %v1607_v46 = vmax.f32 %v1543_v36, 0.0 }
 0x143   : > { %v1046_v41 = vpop.f32.mrf.mxu0  ;;  %v1174_v42 = vpop.f32.mrf.mxu1 }
 0x144   : > { %v1512_v43 = vadd.f32 %v2859_v19, %v1443_v39  ;;  %v1544_v44 = vadd.f32 %v2859_v19, %v1475_v40 }
 0x145   : > { %v1049_v47 = vpop.f32.mrf.mxu0  ;;  %v1177_v48 = vpop.f32.mrf.mxu1 }
 0x146   : > { %v1576_v49 = vmax.f32 %v1512_v43, 0.0  ;;  %v1608_v50 = vmax.f32 %v1544_v44, 0.0  ;;  %v1444_v51 = vmul.f32 %v2853_v15, %v1049_v47  ;;  %v1476_v52 = vmul.f32 %v2853_v15, %v1177_v48 }
 0x147   : > { %v1051_v53 = vpop.f32.mrf.mxu0  ;;  %v1179_v54 = vpop.f32.mrf.mxu1 }
 0x148   : > { %v2357_v55 = vpack.c.bf16 %v1576_v49, %v1575_v45  ;;  %v2437_v56 = vpack.c.bf16 %v1608_v50, %v1607_v46  ;;  %v1513_v57 = vadd.f32 %v2859_v19, %v1444_v51  ;;  %v1545_v58 = vadd.f32 %v2859_v19, %v1476_v52 }
 0x149   : > { %v1052_v59 = vpop.f32.mrf.mxu0  ;;  %v1180_v60 = vpop.f32.mrf.mxu1 }
 0x14a   : > { %2477 = vst [vmem:[%s2874_s25 + $0x48] sm:$0xff] %v2357_v55   ;;  %2493 = vst [vmem:[%s2874_s25 + $0xc8] sm:$0xff] %v2437_v56   ;;  %v1445_v61 = vmul.f32 %v2853_v15, %v1052_v59  ;;  %v1477_v62 = vmul.f32 %v2853_v15, %v1180_v60  ;;  %v1577_v3 = vmax.f32 %v1513_v57, 0.0  ;;  %v1609_v4 = vmax.f32 %v1545_v58, 0.0 }
 0x14b   : > { %v1054_v63 = vpop.f32.mrf.mxu0  ;;  %v1182_v0 = vpop.f32.mrf.mxu1 }
 0x14c   : > { %v1514_v1 = vadd.f32 %v2859_v19, %v1445_v61  ;;  %v1546_v2 = vadd.f32 %v2859_v19, %v1477_v62 }
 0x14d   : > { %v1057_v5 = vpop.f32.mrf.mxu0  ;;  %v1185_v6 = vpop.f32.mrf.mxu1 }
 0x14e   : > { %v1578_v7 = vmax.f32 %v1514_v1, 0.0  ;;  %v1610_v8 = vmax.f32 %v1546_v2, 0.0  ;;  %v1446_v9 = vmul.f32 %v2853_v15, %v1057_v5  ;;  %v1478_v10 = vmul.f32 %v2853_v15, %v1185_v6 }
 0x14f   : > { %v1059_v11 = vpop.f32.mrf.mxu0  ;;  %v1187_v12 = vpop.f32.mrf.mxu1 }
 0x150   : > { %v2362_v13 = vpack.c.bf16 %v1578_v7, %v1577_v3  ;;  %v2442_v14 = vpack.c.bf16 %v1610_v8, %v1609_v4  ;;  %v1515_v16 = vadd.f32 %v2859_v19, %v1446_v9  ;;  %v1547_v17 = vadd.f32 %v2859_v19, %v1478_v10 }
 0x151   : > { %v1060_v18 = vpop.f32.mrf.mxu0  ;;  %v1188_v20 = vpop.f32.mrf.mxu1 }
 0x152   : > { %2478 = vst [vmem:[%s2874_s25 + $0x50] sm:$0xff] %v2362_v13   ;;  %2494 = vst [vmem:[%s2874_s25 + $0xd0] sm:$0xff] %v2442_v14   ;;  %v1447_v21 = vmul.f32 %v2853_v15, %v1060_v18  ;;  %v1479_v22 = vmul.f32 %v2853_v15, %v1188_v20  ;;  %v1579_v27 = vmax.f32 %v1515_v16, 0.0  ;;  %v1611_v28 = vmax.f32 %v1547_v17, 0.0 }
 0x153   : > { %v1062_v23 = vpop.f32.mrf.mxu0  ;;  %v1190_v24 = vpop.f32.mrf.mxu1 }
 0x154   : > { %v1516_v25 = vadd.f32 %v2859_v19, %v1447_v21  ;;  %v1548_v26 = vadd.f32 %v2859_v19, %v1479_v22 }
 0x155   : > { %v1065_v29 = vpop.f32.mrf.mxu0  ;;  %v1193_v30 = vpop.f32.mrf.mxu1 }
 0x156   : > { %v1580_v31 = vmax.f32 %v1516_v25, 0.0  ;;  %v1612_v32 = vmax.f32 %v1548_v26, 0.0  ;;  %v1448_v33 = vmul.f32 %v2853_v15, %v1065_v29  ;;  %v1480_v34 = vmul.f32 %v2853_v15, %v1193_v30 }
 0x157   : > { %v1067_v35 = vpop.f32.mrf.mxu0  ;;  %v1195_v36 = vpop.f32.mrf.mxu1 }
 0x158   : > { %v2367_v37 = vpack.c.bf16 %v1580_v31, %v1579_v27  ;;  %v2447_v38 = vpack.c.bf16 %v1612_v32, %v1611_v28  ;;  %v1517_v39 = vadd.f32 %v2859_v19, %v1448_v33  ;;  %v1549_v40 = vadd.f32 %v2859_v19, %v1480_v34 }
 0x159   : > { %v1068_v41 = vpop.f32.mrf.mxu0  ;;  %v1196_v42 = vpop.f32.mrf.mxu1 }
 0x15a   : > { %2479 = vst [vmem:[%s2874_s25 + $0x58] sm:$0xff] %v2367_v37   ;;  %2495 = vst [vmem:[%s2874_s25 + $0xd8] sm:$0xff] %v2447_v38   ;;  %v1449_v43 = vmul.f32 %v2853_v15, %v1068_v41  ;;  %v1481_v44 = vmul.f32 %v2853_v15, %v1196_v42  ;;  %v1581_v49 = vmax.f32 %v1517_v39, 0.0  ;;  %v1613_v50 = vmax.f32 %v1549_v40, 0.0 }
 0x15b   : > { %v1070_v45 = vpop.f32.mrf.mxu0  ;;  %v1198_v46 = vpop.f32.mrf.mxu1 }
 0x15c   : > { %v1518_v47 = vadd.f32 %v2859_v19, %v1449_v43  ;;  %v1550_v48 = vadd.f32 %v2859_v19, %v1481_v44 }
 0x15d   : > { %v1073_v51 = vpop.f32.mrf.mxu0  ;;  %v1201_v52 = vpop.f32.mrf.mxu1 }
 0x15e   : > { %v1582_v53 = vmax.f32 %v1518_v47, 0.0  ;;  %v1614_v54 = vmax.f32 %v1550_v48, 0.0  ;;  %v1450_v55 = vmul.f32 %v2853_v15, %v1073_v51  ;;  %v1482_v56 = vmul.f32 %v2853_v15, %v1201_v52 }
 0x15f   : > { %v1075_v57 = vpop.f32.mrf.mxu0  ;;  %v1203_v58 = vpop.f32.mrf.mxu1 }
 0x160   : > { %v2372_v59 = vpack.c.bf16 %v1582_v53, %v1581_v49  ;;  %v2452_v60 = vpack.c.bf16 %v1614_v54, %v1613_v50  ;;  %v1519_v61 = vadd.f32 %v2859_v19, %v1450_v55  ;;  %v1551_v62 = vadd.f32 %v2859_v19, %v1482_v56 }
 0x161   : > { %v1076_v63 = vpop.f32.mrf.mxu0  ;;  %v1204_v0 = vpop.f32.mrf.mxu1 }
 0x162   : > { %2480 = vst [vmem:[%s2874_s25 + $0x60] sm:$0xff] %v2372_v59   ;;  %2496 = vst [vmem:[%s2874_s25 + $0xe0] sm:$0xff] %v2452_v60   ;;  %v1451_v1 = vmul.f32 %v2853_v15, %v1076_v63  ;;  %v1483_v2 = vmul.f32 %v2853_v15, %v1204_v0  ;;  %v1583_v7 = vmax.f32 %v1519_v61, 0.0  ;;  %v1615_v8 = vmax.f32 %v1551_v62, 0.0 }
 0x163   : > { %v1078_v3 = vpop.f32.mrf.mxu0  ;;  %v1206_v4 = vpop.f32.mrf.mxu1 }
 0x164   : > { %v1520_v5 = vadd.f32 %v2859_v19, %v1451_v1  ;;  %v1552_v6 = vadd.f32 %v2859_v19, %v1483_v2 }
 0x165   : > { %v1081_v9 = vpop.f32.mrf.mxu0  ;;  %v1209_v10 = vpop.f32.mrf.mxu1 }
 0x166   : > { %v1584_v11 = vmax.f32 %v1520_v5, 0.0  ;;  %v1616_v12 = vmax.f32 %v1552_v6, 0.0  ;;  %v1452_v13 = vmul.f32 %v2853_v15, %v1081_v9  ;;  %v1484_v14 = vmul.f32 %v2853_v15, %v1209_v10 }
 0x167   : > { %v1083_v16 = vpop.f32.mrf.mxu0  ;;  %v1211_v17 = vpop.f32.mrf.mxu1 }
 0x168   : > { %v2377_v18 = vpack.c.bf16 %v1584_v11, %v1583_v7  ;;  %v2457_v20 = vpack.c.bf16 %v1616_v12, %v1615_v8  ;;  %v1521_v21 = vadd.f32 %v2859_v19, %v1452_v13  ;;  %v1553_v22 = vadd.f32 %v2859_v19, %v1484_v14 }
 0x169   : > { %v1084_v23 = vpop.f32.mrf.mxu0  ;;  %v1212_v24 = vpop.f32.mrf.mxu1 }
 0x16a   : > { %2481 = vst [vmem:[%s2874_s25 + $0x68] sm:$0xff] %v2377_v18   ;;  %2497 = vst [vmem:[%s2874_s25 + $0xe8] sm:$0xff] %v2457_v20   ;;  %v1453_v25 = vmul.f32 %v2853_v15, %v1084_v23  ;;  %v1485_v26 = vmul.f32 %v2853_v15, %v1212_v24  ;;  %v1585_v31 = vmax.f32 %v1521_v21, 0.0  ;;  %v1617_v32 = vmax.f32 %v1553_v22, 0.0 }
 0x16b   : > { %v1086_v27 = vpop.f32.mrf.mxu0  ;;  %v1214_v28 = vpop.f32.mrf.mxu1 }
 0x16c   : > { %v1522_v29 = vadd.f32 %v2859_v19, %v1453_v25  ;;  %v1554_v30 = vadd.f32 %v2859_v19, %v1485_v26 }
 0x16d   : > { %v1089_v33 = vpop.f32.mrf.mxu0  ;;  %v1217_v34 = vpop.f32.mrf.mxu1 }
 0x16e   : > { %v1586_v35 = vmax.f32 %v1522_v29, 0.0  ;;  %v1618_v36 = vmax.f32 %v1554_v30, 0.0  ;;  %v1454_v37 = vmul.f32 %v2853_v15, %v1089_v33  ;;  %v1486_v38 = vmul.f32 %v2853_v15, %v1217_v34 }
 0x16f   : > { %v1091_v39 = vpop.f32.mrf.mxu0  ;;  %v1219_v40 = vpop.f32.mrf.mxu1 }
 0x170   : > { %v2382_v41 = vpack.c.bf16 %v1586_v35, %v1585_v31  ;;  %v2462_v42 = vpack.c.bf16 %v1618_v36, %v1617_v32  ;;  %v1523_v45 = vadd.f32 %v2859_v19, %v1454_v37  ;;  %v1555_v46 = vadd.f32 %v2859_v19, %v1486_v38 }
 0x171   : > { %v1092_v43 = vpop.f32.mrf.mxu0  ;;  %v1220_v44 = vpop.f32.mrf.mxu1 }
 0x172   : > { %2482 = vst [vmem:[%s2874_s25 + $0x70] sm:$0xff] %v2382_v41   ;;  %2498 = vst [vmem:[%s2874_s25 + $0xf0] sm:$0xff] %v2462_v42   ;;  %v1455_v47 = vmul.f32 %v2853_v15, %v1092_v43  ;;  %v1487_v48 = vmul.f32 %v2853_v15, %v1220_v44  ;;  %v1587_v53 = vmax.f32 %v1523_v45, 0.0  ;;  %v1619_v54 = vmax.f32 %v1555_v46, 0.0 }
 0x173   : > { %v1094_v49 = vpop.f32.mrf.mxu0  ;;  %v1222_v50 = vpop.f32.mrf.mxu1 }
 0x174   : > { %v1524_v51 = vadd.f32 %v2859_v19, %v1455_v47  ;;  %v1556_v52 = vadd.f32 %v2859_v19, %v1487_v48 }
 0x176   : > { %v1588_v55 = vmax.f32 %v1524_v51, 0.0  ;;  %v1620_v56 = vmax.f32 %v1556_v52, 0.0 }
 0x178   : > { %v2387_v57 = vpack.c.bf16 %v1588_v55, %v1587_v53  ;;  %v2467_v58 = vpack.c.bf16 %v1620_v56, %v1619_v54 }
 0x17a   : > { %2483 = vst [vmem:[%s2874_s25 + $0x78] sm:$0xff] %v2387_v57   ;;  %2499 = vst [vmem:[%s2874_s25 + $0xf8] sm:$0xff] %v2467_v58  }
 0x17b PF: > { %s13_s14 = sadd.s32 1, %s2674_s14   ;;  %s3039_s12 = smov %s2670_s13 }
 0x17c   : > { %p10_p5 = scmp.ge.s32.totalorder %s13_s14, 6   ;;  %s3040_s13 = smov %s3042_s15 }
 0x17e   :  { %12 = sbr.rel (!%p10_p5) target bundleno = 2 (0x2), region = 76 }

</bundles_post_ra>
